<compile_context>
chip_gen: v7x
topology: tpu7x:2x2x1
jax: 0.10.0
libtpu: 0.0.40
codegen_flags: <defaults>
</compile_context>

<pallas_src>
from functools import partial

import numpy as np
import jax
import jax.numpy as jnp
from jax.experimental import pallas as pl
from jax.experimental.pallas import tpu as pltpu


def critic_kernel(obs_ref, fBt_ref,
                  w1o_ref, w1s_ref, w1c_ref, b1_ref,
                  w2_ref, b2_ref, w3_ref, b3_ref,
                  out_ref, *, act_dtype):
    """One batch-tile (batch on the lane axis) of the MLPCritic forward:
       fourier features -> (split) Linear+tanh -> Linear+tanh -> Linear."""
    obs_t = obs_ref[...].astype(jnp.float32)                  # [obs_dim, tb]

    # 2*pi is already folded into fBt on the host: proj = (2*pi*B)^T @ obs^T
    proj = jnp.dot(fBt_ref[...], obs_t,
                   preferred_element_type=jnp.float32)         # [h0/2, tb]

    # Transcendentals in act_dtype (bf16 on v6e/v7x, f32 elsewhere); accum stays f32.
    proj_a = proj.astype(act_dtype)
    sin_p = jnp.sin(proj_a)
    cos_p = jnp.cos(proj_a)

    # First layer with w1 split over [obs | sin | cos] -> no concatenates.
    pre1 = (jnp.dot(w1o_ref[...], obs_t, preferred_element_type=jnp.float32)
            + jnp.dot(w1s_ref[...], sin_p, preferred_element_type=jnp.float32)
            + jnp.dot(w1c_ref[...], cos_p, preferred_element_type=jnp.float32)
            + b1_ref[...])                                     # [h0, tb] f32
    h1 = jnp.tanh(pre1.astype(act_dtype))

    pre2 = jnp.dot(w2_ref[...], h1,
                   preferred_element_type=jnp.float32) + b2_ref[...]  # [h1, tb] f32
    h2 = jnp.tanh(pre2.astype(act_dtype))

    o = jnp.dot(w3_ref[...], h2,
                preferred_element_type=jnp.float32) + b3_ref[...]     # [1, tb] f32

    out_ref[...] = o.astype(out_ref.dtype)


def _round_up(x, m):
    return ((x + m - 1) // m) * m


def _pick_tile(batch, num_cores, cap):
    """Lane-dense (multiple of 128) batch tile, <= cap.  On 2-TC chips the grid
    is (approximately) an even multiple of 2 so both cores get equal work."""
    if num_cores >= 2:
        half = pl.cdiv(batch, 2)
        k = pl.cdiv(half, cap)                  # tiles per core
        return min(cap, _round_up(pl.cdiv(half, k), 128))
    return min(cap, _round_up(batch, 128))


def _chip_traits():
    """(tensorcores_per_chip, bf16_transcendentals_ok) from the device kind."""
    try:
        kind = jax.devices()[0].device_kind.lower()
    except Exception:
        return 1, False
    if "v7" in kind:
        return 2, True
    if "v6" in kind:
        return 1, True
    return 1, False          # v5e/v5p/v4/unknown: no bf16 EUP -> keep f32


@partial(jax.jit, static_argnames=("num_cores", "use_bf16", "tile_cap"))
def mlp_critic_forward(obs, fB, params, *, num_cores=1, use_bf16=False, tile_cap=8192):
    """obs: [B, obs_dim].  fB: [obs_dim, h0//2].
    params: [(W [out,in], b [out])] * 3 (PyTorch-native layout).  Returns [B]."""
    B, obs_dim = obs.shape
    (w1, b1), (w2, b2), (w3, b3) = params
    h_half = fB.shape[1]
    act_dtype = jnp.bfloat16 if use_bf16 else jnp.float32

    tile_b = _pick_tile(B, num_cores, tile_cap)
    grid = (pl.cdiv(B, tile_b),)

    # One transpose so the batch sits on the 128-lane axis.  No pad / no extra
    # astype: the kernel casts after load and Pallas masks the partial last block.
    obs_t = jnp.transpose(obs)                                 # [obs_dim, B]

    # Constants prepared once on the host (all tiny):
    fB_t = (2.0 * np.pi) * jnp.transpose(fB).astype(jnp.float32)   # 2*pi folded in
    w1f = w1.astype(jnp.float32)
    w1_obs = w1f[:, :obs_dim]                                   # f32 (pairs with obs)
    w1_sin = w1f[:, obs_dim:obs_dim + h_half].astype(act_dtype)
    w1_cos = w1f[:, obs_dim + h_half:].astype(act_dtype)
    b1c = b1.reshape(-1, 1).astype(jnp.float32)
    w2c = w2.astype(act_dtype)
    b2c = b2.reshape(-1, 1).astype(jnp.float32)
    w3c = w3.astype(act_dtype)
    b3c = b3.reshape(-1, 1).astype(jnp.float32)

    full = lambda i: (0, 0)   # constants: same full block every grid step
    kern = partial(critic_kernel, act_dtype=act_dtype)

    out2d = pl.pallas_call(
        kern,
        out_shape=jax.ShapeDtypeStruct((1, B), jnp.float32),
        grid_spec=pltpu.PrefetchScalarGridSpec(
            num_scalar_prefetch=0,
            grid=grid,
            in_specs=[
                pl.BlockSpec((obs_dim, tile_b), lambda i: (0, i)),  # obs tile
                pl.BlockSpec(fB_t.shape, full),
                pl.BlockSpec(w1_obs.shape, full),
                pl.BlockSpec(w1_sin.shape, full),
                pl.BlockSpec(w1_cos.shape, full),
                pl.BlockSpec(b1c.shape, full),
                pl.BlockSpec(w2c.shape, full),
                pl.BlockSpec(b2c.shape, full),
                pl.BlockSpec(w3c.shape, full),
                pl.BlockSpec(b3c.shape, full),
            ],
            out_specs=pl.BlockSpec((1, tile_b), lambda i: (0, i)),
        ),
        compiler_params=pltpu.CompilerParams(
            dimension_semantics=("parallel",)),
    )(obs_t, fB_t, w1_obs, w1_sin, w1_cos, b1c, w2c, b2c, w3c, b3c)

    # torch.squeeze(o, -1)
    return out2d[0]


def init_params(key, obs_dim, hidden_sizes, fourier_std=0.1, concat_fourier=True):
    """Deterministic synthetic parameter init, PyTorch-native shapes:
       W: [out_features, in_features], b: [out_features]."""
    h0 = hidden_sizes[0]
    k_fB, k_rest = jax.random.split(key)

    # self.B = Normal(0, fourier_std), shape [obs_dim, hidden_sizes[0] // 2]
    fB = fourier_std * jax.random.normal(k_fB, (obs_dim, h0 // 2), dtype=jnp.float32)

    in_dim = obs_dim + h0 if concat_fourier else h0
    sizes = [in_dim] + list(hidden_sizes) + [1]

    params = []
    keys = jax.random.split(k_rest, len(sizes) - 1)
    for j in range(len(sizes) - 1):
        fan_in, fan_out = sizes[j], sizes[j + 1]
        bound = 1.0 / np.sqrt(fan_in)  # torch.nn.Linear default init range
        kw, kb = jax.random.split(keys[j])
        W = jax.random.uniform(kw, (fan_out, fan_in), jnp.float32, -bound, bound)
        b = jax.random.uniform(kb, (fan_out,), jnp.float32, -bound, bound)
        params.append((W, b))
    return fB, params


def reference_forward(obs, fB, params):
    """Pure-JAX f32 reference mirroring the PyTorch forward (batch-major)."""
    proj = 2.0 * np.pi * obs @ fB
    ff = jnp.concatenate([jnp.sin(proj), jnp.cos(proj)], axis=-1)
    x = jnp.concatenate([obs, ff], axis=-1)
    (w1, b1), (w2, b2), (w3, b3) = params
    h1 = jnp.tanh(x @ w1.T + b1)
    h2 = jnp.tanh(h1 @ w2.T + b2)
    o = h2 @ w3.T + b3
    return jnp.squeeze(o, -1)


if __name__ == "__main__":
    obs_dim = 16
    hidden_sizes = (32, 32)
    batch = 200  # not a multiple of 128: exercises the masked partial last block

    key = jax.random.PRNGKey(0)
    k_obs, k_params = jax.random.split(key)

    obs = jax.random.normal(k_obs, (batch, obs_dim), dtype=jnp.float32)
    fB, params = init_params(k_params, obs_dim, hidden_sizes,
                             fourier_std=0.1, concat_fourier=True)

    num_cores, use_bf16 = _chip_traits()
    try:
        out = jax.block_until_ready(
            mlp_critic_forward(obs, fB, params,
                               num_cores=num_cores, use_bf16=use_bf16))
    except Exception:
        # bf16 transcendentals are a perf-only path (v6e/v7x EUP); fall back to the
        # f32 path if this Mosaic build rejects bf16 sin/cos/tanh lowering.
        use_bf16 = False
        out = jax.block_until_ready(
            mlp_critic_forward(obs, fB, params,
                               num_cores=num_cores, use_bf16=False))

    ref = reference_forward(obs, fB, params)
    assert out.shape == (batch,), out.shape
    tol = 3e-2 if use_bf16 else 1e-5  # bf16 activations vs f32 reference
    np.testing.assert_allclose(np.asarray(out), np.asarray(ref), rtol=tol, atol=tol)

    print("KERNEL_OK")
</pallas_src>

<mosaic_0001>
module attributes {stable_mosaic.version = 11 : i64} {
  func.func @critic_kernel(%arg0: i32, %arg1: memref<16x256xf32, #tpu.memory_space<vmem>>, %arg2: memref<16x16xf32, #tpu.memory_space<vmem>>, %arg3: memref<32x16xf32, #tpu.memory_space<vmem>>, %arg4: memref<32x16xf32, #tpu.memory_space<vmem>>, %arg5: memref<32x16xf32, #tpu.memory_space<vmem>>, %arg6: memref<32x1xf32, #tpu.memory_space<vmem>>, %arg7: memref<32x32xf32, #tpu.memory_space<vmem>>, %arg8: memref<32x1xf32, #tpu.memory_space<vmem>>, %arg9: memref<1x32xf32, #tpu.memory_space<vmem>>, %arg10: memref<1x1xf32, #tpu.memory_space<vmem>>, %arg11: memref<1x256xf32, #tpu.memory_space<vmem>>) attributes {dimension_semantics = [#tpu.dimension_semantics<parallel>], iteration_bounds = array<i64: 1>, scalar_prefetch = 0 : i64, scratch_operands = 0 : i64, tpu.core_type = #tpu.core_type<tc>, window_params = [{transform_indices = @transform_0, window_bounds = array<i64: 16, 256>}, {pipeline_mode = #tpu.pipeline_mode<synchronous>, transform_indices = @transform_1, window_bounds = array<i64: 16, 16>}, {pipeline_mode = #tpu.pipeline_mode<synchronous>, transform_indices = @transform_2, window_bounds = array<i64: 32, 16>}, {pipeline_mode = #tpu.pipeline_mode<synchronous>, transform_indices = @transform_3, window_bounds = array<i64: 32, 16>}, {pipeline_mode = #tpu.pipeline_mode<synchronous>, transform_indices = @transform_4, window_bounds = array<i64: 32, 16>}, {pipeline_mode = #tpu.pipeline_mode<synchronous>, transform_indices = @transform_5, window_bounds = array<i64: 32, 1>}, {pipeline_mode = #tpu.pipeline_mode<synchronous>, transform_indices = @transform_6, window_bounds = array<i64: 32, 32>}, {pipeline_mode = #tpu.pipeline_mode<synchronous>, transform_indices = @transform_7, window_bounds = array<i64: 32, 1>}, {pipeline_mode = #tpu.pipeline_mode<synchronous>, transform_indices = @transform_8, window_bounds = array<i64: 1, 32>}, {pipeline_mode = #tpu.pipeline_mode<synchronous>, transform_indices = @transform_9, window_bounds = array<i64: 1, 1>}, {transform_indices = @transform_10, window_bounds = array<i64: 1, 256>}]} {
    %c0 = arith.constant 0 : index
    %c0_0 = arith.constant 0 : index
    %0 = vector.load %arg1[%c0, %c0_0] : memref<16x256xf32, #tpu.memory_space<vmem>>, vector<16x256xf32>
    %c0_1 = arith.constant 0 : index
    %c0_2 = arith.constant 0 : index
    %1 = vector.load %arg2[%c0_1, %c0_2] : memref<16x16xf32, #tpu.memory_space<vmem>>, vector<16x16xf32>
    %cst = arith.constant dense<0.000000e+00> : vector<16x256xf32>
    %2 = tpu.matmul %1, %0, %cst {dimension_numbers = #tpu.dot_dimension_numbers<[1], [0], [0], [1], [0, 0, 1, 1], [], []>} : vector<16x16xf32>, vector<16x256xf32>, vector<16x256xf32> -> vector<16x256xf32>
    %3 = math.sin %2 : vector<16x256xf32>
    %4 = math.cos %2 : vector<16x256xf32>
    %c0_3 = arith.constant 0 : index
    %c0_4 = arith.constant 0 : index
    %5 = vector.load %arg3[%c0_3, %c0_4] : memref<32x16xf32, #tpu.memory_space<vmem>>, vector<32x16xf32>
    %cst_5 = arith.constant dense<0.000000e+00> : vector<32x256xf32>
    %6 = tpu.matmul %5, %0, %cst_5 {dimension_numbers = #tpu.dot_dimension_numbers<[1], [0], [0], [1], [0, 0, 1, 1], [], []>} : vector<32x16xf32>, vector<16x256xf32>, vector<32x256xf32> -> vector<32x256xf32>
    %c0_6 = arith.constant 0 : index
    %c0_7 = arith.constant 0 : index
    %7 = vector.load %arg4[%c0_6, %c0_7] : memref<32x16xf32, #tpu.memory_space<vmem>>, vector<32x16xf32>
    %cst_8 = arith.constant dense<0.000000e+00> : vector<32x256xf32>
    %8 = tpu.matmul %7, %3, %cst_8 {dimension_numbers = #tpu.dot_dimension_numbers<[1], [0], [0], [1], [0, 0, 1, 1], [], []>} : vector<32x16xf32>, vector<16x256xf32>, vector<32x256xf32> -> vector<32x256xf32>
    %9 = arith.addf %6, %8 : vector<32x256xf32>
    %c0_9 = arith.constant 0 : index
    %c0_10 = arith.constant 0 : index
    %10 = vector.load %arg5[%c0_9, %c0_10] : memref<32x16xf32, #tpu.memory_space<vmem>>, vector<32x16xf32>
    %cst_11 = arith.constant dense<0.000000e+00> : vector<32x256xf32>
    %11 = tpu.matmul %10, %4, %cst_11 {dimension_numbers = #tpu.dot_dimension_numbers<[1], [0], [0], [1], [0, 0, 1, 1], [], []>} : vector<32x16xf32>, vector<16x256xf32>, vector<32x256xf32> -> vector<32x256xf32>
    %12 = arith.addf %9, %11 : vector<32x256xf32>
    %c0_12 = arith.constant 0 : index
    %c0_13 = arith.constant 0 : index
    %13 = vector.load %arg6[%c0_12, %c0_13] : memref<32x1xf32, #tpu.memory_space<vmem>>, vector<32x1xf32>
    %14 = vector.broadcast %13 : vector<32x1xf32> to vector<32x256xf32>
    %15 = arith.addf %12, %14 : vector<32x256xf32>
    %16 = math.tanh %15 : vector<32x256xf32>
    %c0_14 = arith.constant 0 : index
    %c0_15 = arith.constant 0 : index
    %17 = vector.load %arg7[%c0_14, %c0_15] : memref<32x32xf32, #tpu.memory_space<vmem>>, vector<32x32xf32>
    %cst_16 = arith.constant dense<0.000000e+00> : vector<32x256xf32>
    %18 = tpu.matmul %17, %16, %cst_16 {dimension_numbers = #tpu.dot_dimension_numbers<[1], [0], [0], [1], [0, 0, 1, 1], [], []>} : vector<32x32xf32>, vector<32x256xf32>, vector<32x256xf32> -> vector<32x256xf32>
    %c0_17 = arith.constant 0 : index
    %c0_18 = arith.constant 0 : index
    %19 = vector.load %arg8[%c0_17, %c0_18] : memref<32x1xf32, #tpu.memory_space<vmem>>, vector<32x1xf32>
    %20 = vector.broadcast %19 : vector<32x1xf32> to vector<32x256xf32>
    %21 = arith.addf %18, %20 : vector<32x256xf32>
    %22 = math.tanh %21 : vector<32x256xf32>
    %c0_19 = arith.constant 0 : index
    %c0_20 = arith.constant 0 : index
    %23 = vector.load %arg9[%c0_19, %c0_20] : memref<1x32xf32, #tpu.memory_space<vmem>>, vector<1x32xf32>
    %cst_21 = arith.constant dense<0.000000e+00> : vector<1x256xf32>
    %24 = tpu.matmul %23, %22, %cst_21 {dimension_numbers = #tpu.dot_dimension_numbers<[1], [0], [0], [1], [0, 0, 1, 1], [], []>} : vector<1x32xf32>, vector<32x256xf32>, vector<1x256xf32> -> vector<1x256xf32>
    %c0_22 = arith.constant 0 : index
    %c0_23 = arith.constant 0 : index
    %25 = vector.load %arg10[%c0_22, %c0_23] : memref<1x1xf32, #tpu.memory_space<vmem>>, vector<1x1xf32>
    %26 = vector.broadcast %25 : vector<1x1xf32> to vector<1x256xf32>
    %27 = arith.addf %24, %26 : vector<1x256xf32>
    %c0_24 = arith.constant 0 : index
    %c0_25 = arith.constant 0 : index
    %28 = vector.load %arg11[%c0_24, %c0_25] : memref<1x256xf32, #tpu.memory_space<vmem>>, vector<1x256xf32>
    tpu.vector_store %arg11[%c0_24, %c0_25], %27 {strides = array<i32>} : memref<1x256xf32, #tpu.memory_space<vmem>>, vector<1x256xf32>,
    return
  }
  func.func @transform_0(%arg0: i32) -> (i32, i32) {
    %c0_i32 = arith.constant 0 : i32
    %c0_i32_0 = arith.constant 0 : i32
    return %c0_i32, %arg0 : i32, i32
  }
  func.func @transform_1(%arg0: i32) -> (i32, i32) {
    %c0_i32 = arith.constant 0 : i32
    %c0_i32_0 = arith.constant 0 : i32
    %c0_i32_1 = arith.constant 0 : i32
    return %c0_i32, %c0_i32_0 : i32, i32
  }
  func.func @transform_2(%arg0: i32) -> (i32, i32) {
    %c0_i32 = arith.constant 0 : i32
    %c0_i32_0 = arith.constant 0 : i32
    %c0_i32_1 = arith.constant 0 : i32
    return %c0_i32, %c0_i32_0 : i32, i32
  }
  func.func @transform_3(%arg0: i32) -> (i32, i32) {
    %c0_i32 = arith.constant 0 : i32
    %c0_i32_0 = arith.constant 0 : i32
    %c0_i32_1 = arith.constant 0 : i32
    return %c0_i32, %c0_i32_0 : i32, i32
  }
  func.func @transform_4(%arg0: i32) -> (i32, i32) {
    %c0_i32 = arith.constant 0 : i32
    %c0_i32_0 = arith.constant 0 : i32
    %c0_i32_1 = arith.constant 0 : i32
    return %c0_i32, %c0_i32_0 : i32, i32
  }
  func.func @transform_5(%arg0: i32) -> (i32, i32) {
    %c0_i32 = arith.constant 0 : i32
    %c0_i32_0 = arith.constant 0 : i32
    %c0_i32_1 = arith.constant 0 : i32
    return %c0_i32, %c0_i32_0 : i32, i32
  }
  func.func @transform_6(%arg0: i32) -> (i32, i32) {
    %c0_i32 = arith.constant 0 : i32
    %c0_i32_0 = arith.constant 0 : i32
    %c0_i32_1 = arith.constant 0 : i32
    return %c0_i32, %c0_i32_0 : i32, i32
  }
  func.func @transform_7(%arg0: i32) -> (i32, i32) {
    %c0_i32 = arith.constant 0 : i32
    %c0_i32_0 = arith.constant 0 : i32
    %c0_i32_1 = arith.constant 0 : i32
    return %c0_i32, %c0_i32_0 : i32, i32
  }
  func.func @transform_8(%arg0: i32) -> (i32, i32) {
    %c0_i32 = arith.constant 0 : i32
    %c0_i32_0 = arith.constant 0 : i32
    %c0_i32_1 = arith.constant 0 : i32
    return %c0_i32, %c0_i32_0 : i32, i32
  }
  func.func @transform_9(%arg0: i32) -> (i32, i32) {
    %c0_i32 = arith.constant 0 : i32
    %c0_i32_0 = arith.constant 0 : i32
    %c0_i32_1 = arith.constant 0 : i32
    return %c0_i32, %c0_i32_0 : i32, i32
  }
  func.func @transform_10(%arg0: i32) -> (i32, i32) {
    %c0_i32 = arith.constant 0 : i32
    %c0_i32_0 = arith.constant 0 : i32
    return %c0_i32, %arg0 : i32, i32
  }
}

</mosaic_0001>

<bundles_post_ra>
// kernel: mlp_critic_forward.1
= control target key start
LH: loop header
LB: loop body
LE: loop exit
PB: predicated region body
PF: predicated region fallthrough
CT: control target
= control target key end

     0   :  { %s2281_s0 = inlined_call_operand.vmem [shape: f32[16,200], index: 0, kind: input, shape index: {}]   ;;  %s2282_s1 = inlined_call_operand.vmem [shape: f32[16,16], index: 1, kind: input, shape index: {}]   ;;  %s2283_s2 = inlined_call_operand.vmem [shape: f32[32,16], index: 2, kind: input, shape index: {}]   ;;  %s2284_s3 = inlined_call_operand.vmem [shape: f32[32,16], index: 3, kind: input, shape index: {}]   ;;  %s2285_s4 = inlined_call_operand.vmem [shape: f32[32,16], index: 4, kind: input, shape index: {}]   ;;  %s2286_s5 = inlined_call_operand.vmem [shape: f32[32,1], index: 5, kind: input, shape index: {}]   ;;  %s2287_s6 = inlined_call_operand.vmem [shape: f32[32,32], index: 6, kind: input, shape index: {}]   ;;  %s2288_s7 = inlined_call_operand.vmem [shape: f32[32,1], index: 7, kind: input, shape index: {}]   ;;  %s2289_s8 = inlined_call_operand.vmem [shape: f32[1,32], index: 8, kind: input, shape index: {}]   ;;  %s2290_s9 = inlined_call_operand.<no memory space> [shape: f32[1,1], index: 9, kind: input, shape index: {}]   ;;  %s2291_s10 = inlined_call_operand.hbm [shape: f32[1,200], index: 10, kind: output, shape index: {}]  }
   0x1   :  { %v15_v0 = vstv %s2290_s9 }
   0x2   :  { %16 = vst [vmem:[#allocation2] sm:$0x1] %v15_v0 }
   0x3   :  { %v39_v1 = vld [vmem:[%s2281_s0 + $0x8] sm:$0xff]  ;;  %v41_v2 = vld [vmem:[%s2281_s0 + $0x18] sm:$0xff]  ;;  %v38_v3 = vld [vmem:[%s2281_s0] sm:$0xff]  ;;  %v1780_v6 = vmov 0.0  }
   0x4   :  { %v1857_v4 = vpack.c.bf16 %v41_v2, %v39_v1  ;;  %v40_v5 = vld [vmem:[%s2281_s0 + $0x10] sm:$0xff]  ;;  %115 = vmatprep.mubr.f32.mxu0 %v1780_v6  ;;  %1058 = vmatprep.mubr.f32.mxu1 %v1780_v6 }
   0x5   :  { %v1864_v7 = vpack.c.bf16 %v40_v5, %v38_v3 }
   0x6   :  { %17 = vsyncpa [#allocation4], 0  ;;  %1631 = vmatprep.subr.bf16.mxu0 %v1857_v4  ;;  %v42_v8 = vld [vmem:[%s2282_s1] sm:$0xff]  ;;  %vm44_vm0 = vcmask 130048   ;;  %v43_v9 = vld [vmem:[%s2282_s1 + $0x8] sm:$0xff]  ;;  %s1789_s9 = smov [#allocation3]  }
   0x7   :  { %1633 = vmatpush1.bf16.msra.mxu0 %v1864_v7  ;;  %v1781_v39 = vmov 683565275   ;;  %v1782_v43 = vmov 2475754826   ;;  %v1783_v45 = vmov 2131351028  }
   0x8   :  { %v1784_v47 = vmov 2102212464   ;;  %v1785_v49 = vmov 920167782   ;;  %v1786_v56 = vmov 1326507024  }
   0x9   :  { %s1571_s23 = sshll.u32 %s1789_s9, 4  ;;  %s1572_s23 = int_to_ptr.vmem [resolvable:$true] %s1571_s23 }
   0xa   :  { %1579 = vmatmul.mubr.msk.f32.vlgmr.msra.gmra.mrb[0].mxu0 %vm44_vm0, %v42_v8  ;;  %p1761_p1 = scmp.lt.s32.totalorder %s1572_s23, %s1572_s23 }
   0xb   :  { %121 = vmatprep.mubr.f32.mxu0 %v1780_v6 }
   0xe   :  { %1580 = vmatmul.mubr.msk.f32.gmra.mrb[2].mxu0 %vm44_vm0, %v43_v9 }
   0xf   :  { %1040 = vmatprep.mubr.f32.mxu0 %v1780_v6 }
  0xdd   :  { %v1878_v10 = vpop.f32.mrb[0].mxu0 }
  0xde   :  { %v128_v11 = vand.u32 2147483647, %v1878_v10  ;;  %v131_v12 = vand.u32 2139095040, %v1878_v10  ;;  %v1882_v13 = vpop.f32.mrb[1].mxu0 }
  0xdf   :  { %v232_v14 = vand.u32 2147483647, %v1882_v13  ;;  %v235_v15 = vand.u32 2139095040, %v1882_v13 }
  0xe0   :  { %v132_v16 = vshrl.u32 %v131_v12, 23  ;;  %v135_v17 = vand.u32 8388607, %v128_v11 }
  0xe1   :  { %v236_v18 = vshrl.u32 %v235_v15, 23  ;;  %v239_v19 = vand.u32 8388607, %v232_v14  ;;  %v1890_v20 = vpop.f32.mrb[2].mxu0 }
  0xe2   :  { %v1581_v21 = vadd.s32 4294967169, %v132_v16  ;;  %v1892_v22 = vpop.f32.mrb[3].mxu0  ;;  %v339_v24 = vand.u32 2139095040, %v1890_v20  ;;  %v136_v26 = vor.u32 8388608, %v135_v17 }
  0xe3   :  { %v1585_v23 = vadd.s32 4294967169, %v236_v18  ;;  %v240_v27 = vor.u32 8388608, %v239_v19 }
  0xe4   :  { %v138_v25 = vadd.s32 1, %v1581_v21  ;;  %v340_v29 = vshrl.u32 %v339_v24, 23  ;;  %v1895_v35 = vshll.u32 %v136_v26, 8 }
  0xe5   :  { %v242_v28 = vadd.s32 1, %v1585_v23  ;;  %v1899_v37 = vshll.u32 %v240_v27, 8 }
  0xe6   :  { %vm139_vm1 = vcmp.gt.s32.totalorder %v138_v25, 0  ;;  %v1589_v31 = vadd.s32 4294967169, %v340_v29 }
  0xe7   :  { %v140_v30 = vsel %vm139_vm1, %v138_v25, 0  ;;  %vm243_vm2 = vcmp.gt.s32.totalorder %v242_v28, 0 }
  0xe8   :  { %v141_v32 = vshrl.u32 %v140_v30, 5  ;;  %v142_v33 = vand.u32 31, %v140_v30  ;;  %v244_v34 = vsel %vm243_vm2, %v242_v28, 0  ;;  %v1902_v42 = vadd.s32 1, %v1589_v31 }
  0xe9   :  { %v1897_v36 = vshrl.u32 %v244_v34, 5  ;;  %v246_v41 = vand.u32 31, %v244_v34 }
  0xea   :  { %v143_v38 = vsub.s32 32, %v142_v33  ;;  %v145_v40 = vshll.u32 %v1781_v39, %v142_v33  ;;  %v148_v44 = vshll.u32 %v1782_v43, %v142_v33  ;;  %v151_v46 = vshll.u32 %v1783_v45, %v142_v33 }
  0xeb   :  { %v154_v48 = vshll.u32 %v1784_v47, %v142_v33  ;;  %v157_v50 = vshll.u32 %v1785_v49, %v142_v33  ;;  %vm160_vm3 = vcmp.lt.s32.totalorder %v141_v32, 1  ;;  %vm161_vm4 = vcmp.lt.s32.totalorder %v141_v32, 2 }
  0xec   :  { %v146_v51 = vshrl.u32 %v1782_v43, %v143_v38  ;;  %v149_v52 = vshrl.u32 %v1783_v45, %v143_v38  ;;  %v152_v53 = vshrl.u32 %v1784_v47, %v143_v38  ;;  %v144_v54 = vshrl.u32 %v1781_v39, %v143_v38 }
  0xed   :  { %v155_v55 = vshrl.u32 %v1785_v49, %v143_v38  ;;  %v158_v57 = vshrl.u32 %v1786_v56, %v143_v38  ;;  %v247_v61 = vsub.s32 32, %v246_v41  ;;  %vm162_vm5 = vcmp.lt.s32.totalorder %v141_v32, 3 }
  0xee   :  { %v147_v58 = vor.u32 %v146_v51, %v145_v40  ;;  %v150_v59 = vor.u32 %v149_v52, %v148_v44  ;;  %v153_v60 = vor.u32 %v152_v53, %v151_v46  ;;  %vm163_vm6 = vcmp.lt.s32.totalorder %v141_v32, 4 }
  0xef   :  { %v156_v62 = vor.u32 %v155_v55, %v154_v48  ;;  %v159_v63 = vor.u32 %v158_v57, %v157_v50  ;;  %v249_v12 = vshll.u32 %v1781_v39, %v246_v41  ;;  %v250_v17 = vshrl.u32 %v1782_v43, %v247_v61 }
  0xf0   :  { %v164_v0 = vsel %vm160_vm3, %v144_v54, %v147_v58  ;;  %v165_v1 = vsel %vm163_vm6, %v153_v60, 2102212464  ;;  %v168_v2 = vsel %vm160_vm3, %v147_v58, %v150_v59  ;;  %v172_v3 = vsel %vm160_vm3, %v150_v59, %v153_v60 }
  0xf1   :  { %v166_v5 = vsel %vm162_vm5, %v150_v59, %v165_v1  ;;  %v169_v8 = vsel %vm163_vm6, %v156_v62, 920167782  ;;  %v173_v9 = vsel %vm163_vm6, %v159_v63, 1326507024  ;;  %v252_v18 = vshll.u32 %v1782_v43, %v246_v41 }
  0xf2   :  { %v170_v15 = vsel %vm162_vm5, %v153_v60, %v169_v8  ;;  %v174_v16 = vsel %vm162_vm5, %v156_v62, %v173_v9  ;;  %v167_v19 = vsel %vm161_vm4, %v164_v0, %v166_v5  ;;  %v253_v24 = vshrl.u32 %v1783_v45, %v247_v61 }
  0xf3   :  { %v171_v21 = vsel %vm161_vm4, %v168_v2, %v170_v15  ;;  %v175_v23 = vsel %vm161_vm4, %v172_v3, %v174_v16  ;;  %v251_v29 = vor.u32 %v250_v17, %v249_v12  ;;  %v255_v31 = vshll.u32 %v1783_v45, %v246_v41 }
  0xf4   :  { %v1925_v25 = vmul.u32.u64.low %v1895_v35, %v175_v23  ;;  %v1926_v26 = vmul.u32.u64.high %v1895_v35, %v175_v23, %v1925_v25  ;;  %v1929_v27 = vmul.u32.u64.low %v1895_v35, %v171_v21  ;;  %v1930_v28 = vmul.u32.u64.high %v1895_v35, %v171_v21, %v1929_v27 }
  0xf5   :  { %v254_v30 = vor.u32 %v253_v24, %v252_v18  ;;  %v256_v33 = vshrl.u32 %v1784_v47, %v247_v61  ;;  %v248_v32 = vshrl.u32 %v1781_v39, %v247_v61  ;;  %v258_v34 = vshll.u32 %v1784_v47, %v246_v41 }
  0xf6   :  { %v259_v38 = vshrl.u32 %v1785_v49, %v247_v61  ;;  %v262_v40 = vshrl.u32 %v1786_v56, %v247_v61  ;;  %v183_v44 = vmul.u32 %v1895_v35, %v167_v19  ;;  %v261_v48 = vshll.u32 %v1785_v49, %v246_v41 }
  0xf7   :  { %v257_v46 = vor.u32 %v256_v33, %v255_v31  ;;  %vm264_vm7 = vcmp.lt.s32.totalorder %v1897_v36, 1  ;;  %vm185_vm8 = vc.u32 %v1926_v26, %v1929_v27  ;;  %v186_v50 = vadd.s32 1, %v1930_v28 }
  0xf8   :  { %v260_v51 = vor.u32 %v259_v38, %v258_v34  ;;  %vm265_vm9 = vcmp.lt.s32.totalorder %v1897_v36, 2  ;;  %v263_v52 = vor.u32 %v262_v40, %v261_v48  ;;  %vm266_vm10 = vcmp.lt.s32.totalorder %v1897_v36, 3 }
  0xf9   :  { %vm267_vm11 = vcmp.lt.s32.totalorder %v1897_v36, 4  ;;  %v272_v53 = vsel %vm264_vm7, %v251_v29, %v254_v30  ;;  %v187_v35 = vsel %vm185_vm8, %v186_v50, %v1930_v28  ;;  %v276_v55 = vsel %vm264_vm7, %v254_v30, %v257_v46 }
  0xfa   :  { %v269_v54 = vsel %vm267_vm11, %v257_v46, 2102212464  ;;  %v273_v41 = vsel %vm267_vm11, %v260_v51, 920167782  ;;  %v188_v57 = vadd.s32 %v187_v35, %v183_v44  ;;  %v268_v58 = vsel %vm264_vm7, %v248_v32, %v251_v29 }
  0xfb   :  { %v274_v59 = vsel %vm266_vm10, %v257_v46, %v273_v41  ;;  %v277_v60 = vsel %vm267_vm11, %v263_v52, 1326507024  ;;  %v270_v61 = vsel %vm266_vm10, %v254_v30, %v269_v54  ;;  %vm347_vm12 = vcmp.gt.s32.totalorder %v1902_v42, 0 }
  0xfc   :  { %v275_v62 = vsel %vm265_vm9, %v272_v53, %v274_v59  ;;  %v278_v63 = vsel %vm266_vm10, %v260_v51, %v277_v60  ;;  %v189_v0 = vadd.s32 536870912, %v188_v57  ;;  %v348_v9 = vsel %vm347_vm12, %v1902_v42, 0 }
  0xfd   :  { %v279_v1 = vsel %vm265_vm9, %v276_v55, %v278_v63  ;;  %v1955_v2 = vmul.u32.u64.low %v1899_v37, %v275_v62  ;;  %v1956_v3 = vmul.u32.u64.high %v1899_v37, %v275_v62, %v1955_v2  ;;  %v271_v15 = vsel %vm265_vm9, %v268_v58, %v270_v61 }
  0xfe   :  { %v1960_v5 = vmul.u32.u64.low %v1899_v37, %v279_v1  ;;  %v1961_v8 = vmul.u32.u64.high %v1899_v37, %v279_v1, %v1960_v5  ;;  %v1964_v12 = vshrl.u32 %v189_v0, 30  ;;  %v350_v16 = vand.u32 31, %v348_v9 }
  0xff   :  { %v336_v17 = vand.u32 2147483647, %v1890_v20  ;;  %v290_v19 = vadd.s32 1, %v1956_v3  ;;  %v287_v23 = vmul.u32 %v1899_v37, %v271_v15  ;;  %v349_v30 = vshrl.u32 %v348_v9, 5 }
 0x100   :  { %v191_v18 = vshll.u32 %v1964_v12, 30  ;;  %v351_v21 = vsub.s32 32, %v350_v16  ;;  %vm289_vm13 = vc.u32 %v1961_v8, %v1955_v2  ;;  %v443_v37 = vand.u32 2139095040, %v1892_v22 }
 0x101   :  { %v291_v42 = vsel %vm289_vm13, %v290_v19, %v1956_v3  ;;  %v343_v36 = vand.u32 8388607, %v336_v17  ;;  %v353_v32 = vshll.u32 %v1781_v39, %v350_v16  ;;  %v356_v34 = vshll.u32 %v1782_v43, %v350_v16 }
 0x102   :  { %v1974_v24 = vsub.s32 %v188_v57, %v191_v18  ;;  %v292_v25 = vadd.s32 %v291_v42, %v287_v23  ;;  %v354_v28 = vshrl.u32 %v1782_v43, %v351_v21  ;;  %v357_v31 = vshrl.u32 %v1783_v45, %v351_v21 }
 0x103   :  { %v360_v38 = vshrl.u32 %v1784_v47, %v351_v21  ;;  %v359_v44 = vshll.u32 %v1783_v45, %v350_v16  ;;  %v362_v46 = vshll.u32 %v1784_v47, %v350_v16  ;;  %v363_v48 = vshrl.u32 %v1785_v49, %v351_v21 }
 0x104   :  { %v194_v29 = vsub.s32 0, %v1974_v24  ;;  %v293_v33 = vadd.s32 536870912, %v292_v25  ;;  %v344_v51 = vor.u32 8388608, %v343_v36  ;;  %v355_v52 = vor.u32 %v354_v28, %v353_v32 }
 0x105   :  { %v366_v53 = vshrl.u32 %v1786_v56, %v351_v21  ;;  %v358_v54 = vor.u32 %v357_v31, %v356_v34  ;;  %v361_v41 = vor.u32 %v360_v38, %v359_v44  ;;  %v364_v55 = vor.u32 %v363_v48, %v362_v46 }
 0x106   :  { %v1582_v40 = vmin.u32 %v194_v29, %v1974_v24  ;;  %v1990_v50 = vshrl.u32 %v293_v33, 30  ;;  %v365_v58 = vshll.u32 %v1785_v49, %v350_v16  ;;  %v444_v59 = vshrl.u32 %v443_v37, 23 }
 0x107   :  { %vm368_vm14 = vcmp.lt.s32.totalorder %v349_v30, 1  ;;  %vm371_vm15 = vcmp.lt.s32.totalorder %v349_v30, 4  ;;  %vm370_vm1 = vcmp.lt.s32.totalorder %v349_v30, 3  ;;  %v384_v3 = vshll.u32 %v344_v51, 8 }
 0x108   :  { %v196_v35 = vclz %v1582_v40  ;;  %v295_v57 = vshll.u32 %v1990_v50, 30  ;;  %v367_v62 = vor.u32 %v366_v53, %v365_v58  ;;  %v377_v63 = vsel %vm371_vm15, %v364_v55, 920167782 }
 0x109   :  { %v376_v0 = vsel %vm368_vm14, %v355_v52, %v358_v54  ;;  %v378_v1 = vsel %vm370_vm1, %v361_v41, %v377_v63  ;;  %v373_v15 = vsel %vm371_vm15, %v361_v41, 2102212464  ;;  %v1593_v16 = vadd.s32 4294967169, %v444_v59 }
 0x10a   :  { %v1583_v60 = vadd.s32 4294967294, %v196_v35  ;;  %v1995_v61 = vsub.s32 %v292_v25, %v295_v57  ;;  %v352_v23 = vshrl.u32 %v1781_v39, %v351_v21  ;;  %vm369_vm3 = vcmp.lt.s32.totalorder %v349_v30, 2 }
 0x10b   :  { %v379_v25 = vsel %vm369_vm3, %v376_v0, %v378_v1  ;;  %v380_v36 = vsel %vm368_vm14, %v358_v54, %v361_v41  ;;  %v381_v28 = vsel %vm371_vm15, %v367_v62, 1326507024  ;;  %v374_v37 = vsel %vm370_vm1, %v358_v54, %v373_v15 }
 0x10c   :  { %vm1584_vm2 = vcmp.lt.s32.totalorder %v1583_v60, 0  ;;  %v298_v9 = vsub.s32 0, %v1995_v61  ;;  %v372_v31 = vsel %vm368_vm14, %v352_v23, %v355_v52  ;;  %v382_v33 = vsel %vm370_vm1, %v364_v55, %v381_v28 }
 0x10d   :  { %v199_v5 = vsel %vm1584_vm2, 0, %v1583_v60  ;;  %v184_v32 = vadd.s32 %v1929_v27, %v1926_v26  ;;  %v383_v21 = vsel %vm369_vm3, %v380_v36, %v382_v33  ;;  %v375_v52 = vsel %vm369_vm3, %v372_v31, %v374_v37 }
 0x10e   :  { %v200_v18 = vsub.s32 32, %v199_v5  ;;  %v204_v19 = vsub.s32 4294967266, %v199_v5  ;;  %v1586_v42 = vmin.u32 %v298_v9, %v1995_v61  ;;  %v450_v53 = vadd.s32 1, %v1593_v16 }
 0x10f   :  { %v2013_v34 = vmul.u32.u64.low %v384_v3, %v379_v25  ;;  %v2014_v38 = vmul.u32.u64.high %v384_v3, %v379_v25, %v2013_v34  ;;  %v2017_v46 = vmul.u32.u64.low %v384_v3, %v383_v21  ;;  %v2018_v48 = vmul.u32.u64.high %v384_v3, %v383_v21, %v2017_v46 }
 0x110   :  { %v205_v29 = vadd.s32 127, %v204_v19  ;;  %v300_v44 = vclz %v1586_v42  ;;  %v202_v51 = vshrl.u32 %v184_v32, %v200_v18  ;;  %v201_v35 = vshll.u32 %v1974_v24, %v199_v5 }
 0x111   :  { %v394_v26 = vadd.s32 1, %v2014_v38  ;;  %vm451_vm4 = vcmp.gt.s32.totalorder %v450_v53, 0  ;;  %v391_v41 = vmul.u32 %v384_v3, %v375_v52  ;;  %vm393_vm5 = vc.u32 %v2018_v48, %v2013_v34 }
 0x112   :  { %v206_v40 = vshll.u32 %v205_v29, 23  ;;  %v1587_v27 = vadd.s32 4294967294, %v300_v44  ;;  %v203_v55 = vor.u32 %v202_v51, %v201_v35  ;;  %v440_v59 = vand.u32 2147483647, %v1892_v22 }
 0x113   :  { %v395_v57 = vsel %vm393_vm5, %v394_v26, %v2014_v38  ;;  %v452_v30 = vsel %vm451_vm4, %v450_v53, 0  ;;  %vm2050_vm7 = vcmp.le.f32.partialorder %v128_v11, 0.7853982  ;;  %vm130_vm8 = vcmp.lt.s32.totalorder %v1878_v10, 0 }
 0x114   :  { %v207_v54 = vor.u32 4788187, %v206_v40  ;;  %v396_v58 = vadd.s32 %v395_v57, %v391_v41  ;;  %v454_v62 = vand.u32 31, %v452_v30  ;;  %vm1588_vm6 = vcmp.lt.s32.totalorder %v1587_v27, 0 }
 0x115   :  { %v210_v63 = vcvt.s32.f32 %v203_v55  ;;  %v447_v3 = vand.u32 8388607, %v440_v59  ;;  %v2031_v9 = vsel %vm1588_vm6, 0, %v1587_v27  ;;  %v453_v29 = vshrl.u32 %v452_v30, 5 }
 0x116   :  { %v208_v60 = vand.u32 2147483647, %v207_v54  ;;  %v397_v24 = vadd.s32 536870912, %v396_v58  ;;  %v455_v0 = vsub.s32 32, %v454_v62  ;;  %v308_v23 = vsub.s32 4294967266, %v2031_v9 }
 0x117   :  { %v448_v25 = vor.u32 8388608, %v447_v3  ;;  %v463_v36 = vshll.u32 %v1783_v45, %v454_v62  ;;  %v457_v31 = vshll.u32 %v1781_v39, %v454_v62  ;;  %v460_v37 = vshll.u32 %v1782_v43, %v454_v62 }
 0x118   :  { %v2027_v1 = vshrl.u32 %v397_v24, 30  ;;  %v211_v5 = vmul.f32 %v210_v63, %v208_v60  ;;  %v458_v16 = vshrl.u32 %v1782_v43, %v455_v0  ;;  %v461_v18 = vshrl.u32 %v1783_v45, %v455_v0 }
 0x119   :  { %v464_v19 = vshrl.u32 %v1784_v47, %v455_v0  ;;  %v466_v21 = vshll.u32 %v1784_v47, %v454_v62  ;;  %v467_v38 = vshrl.u32 %v1785_v49, %v455_v0  ;;  %v469_v46 = vshll.u32 %v1785_v49, %v454_v62 }
 0x11a   :  { %v399_v15 = vshll.u32 %v2027_v1, 30  ;;  %v212_v28 = vxor.u32 2147483648, %v211_v5  ;;  %v459_v40 = vor.u32 %v458_v16, %v457_v31  ;;  %v462_v44 = vor.u32 %v461_v18, %v460_v37 }
 0x11b   :  { %v465_v32 = vor.u32 %v464_v19, %v463_v36  ;;  %v470_v51 = vshrl.u32 %v1786_v56, %v455_v0  ;;  %v468_v52 = vor.u32 %v467_v38, %v466_v21  ;;  %v309_v47 = vadd.s32 127, %v308_v23 }
 0x11c   :  { %v2038_v42 = vsub.s32 %v396_v58, %v399_v15  ;;  %vm475_vm9 = vcmp.lt.s32.totalorder %v453_v29, 4  ;;  %v488_v35 = vshll.u32 %v448_v25, 8  ;;  %v456_v49 = vshrl.u32 %v1781_v39, %v455_v0 }
 0x11d   :  { %v471_v53 = vor.u32 %v470_v51, %v469_v46  ;;  %vm472_vm10 = vcmp.lt.s32.totalorder %v453_v29, 1  ;;  %v477_v56 = vsel %vm475_vm9, %v465_v32, 2102212464  ;;  %v213_v11 = vsel %vm130_vm8, %v212_v28, %v211_v5 }
 0x11e   :  { %v402_v33 = vsub.s32 0, %v2038_v42  ;;  %vm474_vm11 = vcmp.lt.s32.totalorder %v453_v29, 3  ;;  %v480_v26 = vsel %vm472_vm10, %v459_v40, %v462_v44  ;;  %v481_v27 = vsel %vm475_vm9, %v468_v52, 920167782 }
 0x11f   :  { %vm473_vm12 = vcmp.lt.s32.totalorder %v453_v29, 2  ;;  %v476_v55 = vsel %vm472_vm10, %v456_v49, %v459_v40  ;;  %v482_v57 = vsel %vm474_vm11, %v465_v32, %v481_v27  ;;  %v478_v58 = vsel %vm474_vm11, %v462_v44, %v477_v56  ;;  %v1281_v27 = vld [vmem:[%s2286_s5 + $0x10] sm:$0xff] }
 0x120   :  { %v1590_v43 = vmin.u32 %v402_v33, %v2038_v42  ;;  %v483_v30 = vsel %vm473_vm12, %v480_v26, %v482_v57  ;;  %v484_v60 = vsel %vm472_vm10, %v462_v44, %v465_v32  ;;  %v485_v39 = vsel %vm475_vm9, %v471_v53, 1326507024  ;;  %v1279_v26 = vld [vmem:[%s2286_s5] sm:$0xff] }
 0x121   :  { %v486_v62 = vsel %vm474_vm11, %v468_v52, %v485_v39  ;;  %v2063_v24 = vmul.u32.u64.low %v488_v35, %v483_v30  ;;  %v2064_v63 = vmul.u32.u64.high %v488_v35, %v483_v30, %v2063_v24  ;;  %v288_v0 = vadd.s32 %v1955_v2, %v1961_v8 }
 0x122   :  { %v404_v54 = vclz %v1590_v43  ;;  %v392_v3 = vadd.s32 %v2013_v34, %v2018_v48  ;;  %v487_v15 = vsel %vm473_vm12, %v484_v60, %v486_v62  ;;  %v304_v16 = vsub.s32 32, %v2031_v9 }
 0x123   :  { %v310_v18 = vshll.u32 %v309_v47, 23  ;;  %v216_v25 = vsel %vm2050_vm7, %v1878_v10, %v213_v11  ;;  %v479_v36 = vsel %vm473_vm12, %v476_v55, %v478_v58  ;;  %v498_v48 = vadd.s32 1, %v2064_v63 }
 0x124   :  { %v1591_v41 = vadd.s32 4294967294, %v404_v54  ;;  %v2077_v28 = vmul.u32.u64.low %v488_v35, %v487_v15  ;;  %v2078_v31 = vmul.u32.u64.high %v488_v35, %v487_v15, %v2077_v28  ;;  %v214_v37 = vsub.s32 4, %v1964_v12 }
 0x125   :  { %1708 = vcosq.f32 %v216_v25  ;;  %v306_v33 = vshrl.u32 %v288_v0, %v304_v16  ;;  %v495_v38 = vmul.u32 %v488_v35, %v479_v36  ;;  %v305_v29 = vshll.u32 %v1995_v61, %v2031_v9  ;;  %v1324_v36 = vld [vmem:[%s2288_s7 + $0x8] sm:$0xff] }
 0x126   :  { %vm1592_vm13 = vcmp.lt.s32.totalorder %v1591_v41, 0  ;;  %1710 = vsinq.f32 %v216_v25  ;;  %vm497_vm14 = vc.u32 %v2078_v31, %v2063_v24  ;;  %v311_v40 = vor.u32 4788187, %v310_v18  ;;  %v1323_v25 = vld [vmem:[%s2288_s7] sm:$0xff] }
 0x127   :  { %v407_v5 = vsel %vm1592_vm13, 0, %v1591_v41  ;;  %v499_v44 = vsel %vm497_vm14, %v498_v48, %v2064_v63  ;;  %v215_v46 = vsel %vm130_vm8, %v214_v37, %v1964_v12  ;;  %v422_v51 = vsub.s32 4, %v2027_v1  ;;  %v1282_v63 = vld [vmem:[%s2286_s5 + $0x18] sm:$0xff] }
 0x128   :  { %v408_v19 = vsub.s32 32, %v407_v5  ;;  %v412_v23 = vsub.s32 4294967266, %v407_v5  ;;  %v409_v2 = vshll.u32 %v2038_v42, %v407_v5  ;;  %v500_v43 = vadd.s32 %v499_v44, %v495_v38 }
 0x129   :  { %v307_v52 = vor.u32 %v306_v33, %v305_v29  ;;  %v217_v54 = vsel %vm2050_vm7, 0, %v215_v46  ;;  %v312_v49 = vand.u32 2147483647, %v311_v40  ;;  %vm338_vm15 = vcmp.lt.s32.totalorder %v1890_v20, 0  ;;  %v1325_v29 = vld [vmem:[%s2288_s7 + $0x10] sm:$0xff]  ;;  %v1326_v40 = vld [vmem:[%s2288_s7 + $0x18] sm:$0xff] }
 0x12a   :  { %v410_v8 = vshrl.u32 %v392_v3, %v408_v19  ;;  %v413_v34 = vadd.s32 127, %v412_v23  ;;  %v501_v35 = vadd.s32 536870912, %v500_v43  ;;  %v423_v9 = vsel %vm338_vm15, %v422_v51, %v2027_v1 }
 0x12b   :  { %v314_v11 = vcvt.s32.f32 %v307_v52  ;;  %v221_v45 = vadd.s32 3, %v217_v54  ;;  %vm337_vm1 = vcmp.le.f32.partialorder %v336_v17, 0.7853982  ;;  %v1787_v30 = vmov 0   ;;  %v1280_v17 = vld [vmem:[%s2286_s5 + $0x8] sm:$0xff] }
 0x12c   :  { %v411_v32 = vor.u32 %v410_v8, %v409_v2  ;;  %v414_v21 = vshll.u32 %v413_v34, 23  ;;  %v2096_v56 = vshrl.u32 %v501_v35, 30  ;;  %v425_v58 = vsel %vm337_vm1, 0, %v423_v9  ;;  %1706 = vset.pattern.permute.xlu0 %v1787_v30  ;;  %1707 = vset.pattern.permute.xlu1 %v1787_v30  ;;  %v1458_v9 = vld [vmem:[#allocation2] sm:$0x1] }
 0x12d   :  { %v315_v1 = vmul.f32 %v314_v11, %v312_v49  ;;  %1285 = vperm.xlu0 %1706, %v1279_v26   ;;  %1295 = vperm.xlu1 %1707, %v1281_v27   ;;  %v222_v0 = vand.u32 3, %v221_v45  ;;  %v429_v3 = vadd.s32 3, %v425_v58  ;;  %v637_v19 = vand.u32 3, %v217_v54 }
 0x12e   :  { %v415_v42 = vor.u32 4788187, %v414_v21  ;;  %v418_v53 = vcvt.s32.f32 %v411_v32  ;;  %v503_v41 = vshll.u32 %v2096_v56, 30  ;;  %vm234_vm2 = vcmp.lt.s32.totalorder %v1882_v13, 0 }
 0x12f   :  { %v1709_v55 = vpop.eup %1708  ;;  %v316_v15 = vxor.u32 2147483648, %v315_v1  ;;  %v430_v28 = vand.u32 3, %v429_v3  ;;  %vm224_vm3 = vcmp.eq.s32.totalorder %v222_v0, 0  ;;  %vm227_vm4 = vcmp.eq.s32.totalorder %v222_v0, 2 }
 0x130   :  { %v416_v47 = vand.u32 2147483647, %v415_v42  ;;  %v1711_v60 = vpop.eup %1710  ;;  %v2108_v62 = vsub.s32 %v500_v43, %v503_v41  ;;  %v228_v18 = vxor.u32 2147483648, %v1709_v55  ;;  %vm2127_vm5 = vcmp.le.f32.partialorder %v232_v14, 0.7853982 }
 0x131   :  { %v225_v16 = vxor.u32 2147483648, %v1711_v60  ;;  %1290 = vperm.xlu0 %1706, %v1280_v17   ;;  %1300 = vperm.xlu1 %1707, %v1282_v63   ;;  %v317_v34 = vsel %vm234_vm2, %v316_v15, %v315_v1  ;;  %vm220_vm6 = vweird.f32 %v1878_v10  ;;  %v318_v33 = vsub.s32 4, %v1990_v50 }
 0x132   :  { %v419_v61 = vmul.f32 %v418_v53, %v416_v47  ;;  %v506_v5 = vsub.s32 0, %v2108_v62  ;;  %v229_v37 = vsel %vm227_vm4, %v228_v18, %v1711_v60  ;;  %vm428_vm7 = vweird.f32 %v1890_v20 }
 0x133   :  { %v226_v48 = vsel %vm224_vm3, %v1709_v55, %v225_v16  ;;  %vm639_vm8 = vcmp.eq.s32.totalorder %v637_v19, 0  ;;  %vm642_vm9 = vcmp.eq.s32.totalorder %v637_v19, 2  ;;  %v843_v14 = vand.u32 3, %v425_v58 }
 0x134   :  { %v420_v12 = vxor.u32 2147483648, %v419_v61  ;;  %v1594_v23 = vmin.u32 %v506_v5, %v2108_v62  ;;  %vm223_vm10 = vcmp.lt.s32.totalorder %v222_v0, 2  ;;  %v641_v21 = vsel %vm639_vm8, %v1709_v55, %v225_v16 }
 0x135   :  { %1329 = vperm.xlu0 %1706, %v1323_v25   ;;  %1334 = vperm.xlu1 %1707, %v1324_v36   ;;  %v644_v38 = vsel %vm642_vm9, %v228_v18, %v1711_v60  ;;  %v320_v42 = vsel %vm2127_vm5, %v1882_v13, %v317_v34  ;;  %v230_v44 = vsel %vm223_vm10, %v226_v48, %v229_v37  ;;  %vm432_vm12 = vcmp.eq.s32.totalorder %v430_v28, 0 }
 0x136   :  { %v421_v57 = vsel %vm338_vm15, %v420_v12, %v419_v61  ;;  %v508_v2 = vclz %v1594_v23  ;;  %v496_v51 = vadd.s32 %v2063_v24, %v2078_v31  ;;  %vm435_vm13 = vcmp.eq.s32.totalorder %v430_v28, 2 }
 0x137   :  { %v424_v39 = vsel %vm337_vm1, %v1890_v20, %v421_v57  ;;  %vm638_vm14 = vcmp.lt.s32.totalorder %v637_v19, 2  ;;  %vm845_vm15 = vcmp.eq.s32.totalorder %v843_v14, 0  ;;  %vm848_vm1 = vcmp.eq.s32.totalorder %v843_v14, 2 }
 0x138   :  { %1712 = vcosq.f32 %v424_v39  ;;  %v1595_v32 = vadd.s32 4294967294, %v508_v2  ;;  %v645_v54 = vsel %vm638_vm14, %v641_v21, %v644_v38  ;;  %vm431_vm3 = vcmp.lt.s32.totalorder %v430_v28, 2 }
 0x139   :  { %1714 = vsinq.f32 %v424_v39  ;;  %1339 = vperm.xlu0 %1706, %v1325_v29   ;;  %1344 = vperm.xlu1 %1707, %v1326_v40   ;;  %vm844_vm4 = vcmp.lt.s32.totalorder %v843_v14, 2  ;;  %v231_v57 = vsel %vm220_vm6, nan, %v230_v44  ;;  %v2156_v30 = vsel %vm220_vm6, nan, %v645_v54 }
 0x13a   :  { %vm1596_vm11 = vcmp.lt.s32.totalorder %v1595_v32, 0  ;;  %1716 = vcosq.f32 %v320_v42  ;;  %v319_v10 = vsel %vm234_vm2, %v318_v33, %v1990_v50  ;;  %v526_v5 = vsub.s32 4, %v2096_v56 }
 0x13b   :  { %v511_v43 = vsel %vm1596_vm11, 0, %v1595_v32  ;;  %1718 = vsinq.f32 %v320_v42  ;;  %v321_v20 = vsel %vm2127_vm5, 0, %v319_v10  ;;  %vm442_vm6 = vcmp.lt.s32.totalorder %v1892_v22, 0 }
 0x13c   :  { %v512_v47 = vsub.s32 32, %v511_v43  ;;  %v516_v53 = vsub.s32 4294967266, %v511_v43  ;;  %v513_v49 = vshll.u32 %v2108_v62, %v511_v43  ;;  %v527_v18 = vsel %vm442_vm6, %v526_v5, %v2096_v56 }
 0x13d   :  { %1461 = vperm.xlu0 %1706, %v1458_v9   ;;  %v325_v19 = vadd.s32 3, %v321_v20  ;;  %v740_v28 = vand.u32 3, %v321_v20 }
 0x13e   :  { %v514_v11 = vshrl.u32 %v496_v51, %v512_v47  ;;  %v517_v12 = vadd.s32 127, %v516_v53 }
 0x13f   :  { %v326_v2 = vand.u32 3, %v325_v19  ;;  %vm742_vm8 = vcmp.eq.s32.totalorder %v740_v28, 0  ;;  %vm745_vm9 = vcmp.eq.s32.totalorder %v740_v28, 2  ;;  %vm741_vm11 = vcmp.lt.s32.totalorder %v740_v28, 2 }
 0x140   :  { %v515_v45 = vor.u32 %v514_v11, %v513_v49  ;;  %v518_v41 = vshll.u32 %v517_v12, 23  ;;  %v956_v12 = vld [vmem:[%s2283_s2] sm:$0xff] }
 0x141   :  { %vm328_vm2 = vcmp.eq.s32.totalorder %v326_v2, 0  ;;  %vm331_vm5 = vcmp.eq.s32.totalorder %v326_v2, 2  ;;  %vm327_vm10 = vcmp.lt.s32.totalorder %v326_v2, 2 }
 0x142   :  { %v1713_v46 = vpop.eup %1712  ;;  %v519_v39 = vor.u32 4788187, %v518_v41  ;;  %v522_v0 = vcvt.s32.f32 %v515_v45  ;;  %v1167_v45 = vld [vmem:[%s2285_s4 + $0x8] sm:$0xff]  ;;  %v1168_v41 = vld [vmem:[%s2285_s4 + $0x10] sm:$0xff] }
 0x143   :  { %v1715_v52 = vpop.eup %1714  ;;  %v436_v35 = vxor.u32 2147483648, %v1713_v46 }
 0x144   :  { %v433_v61 = vxor.u32 2147483648, %v1715_v52  ;;  %v520_v63 = vand.u32 2147483647, %v519_v39  ;;  %v1717_v25 = vpop.eup %1716 }
 0x145   :  { %v437_v24 = vsel %vm435_vm13, %v436_v35, %v1715_v52  ;;  %v850_v31 = vsel %vm848_vm1, %v436_v35, %v1715_v52  ;;  %v1719_v50 = vpop.eup %1718  ;;  %v332_v48 = vxor.u32 2147483648, %v1717_v25 }
 0x146   :  { %v434_v26 = vsel %vm432_vm12, %v1713_v46, %v433_v61  ;;  %v847_v27 = vsel %vm845_vm15, %v1713_v46, %v433_v61  ;;  %v523_v3 = vmul.f32 %v522_v0, %v520_v63  ;;  %v329_v34 = vxor.u32 2147483648, %v1719_v50 }
 0x147   :  { %v438_v55 = vsel %vm431_vm3, %v434_v26, %v437_v24  ;;  %v851_v1 = vsel %vm844_vm4, %v847_v27, %v850_v31  ;;  %v333_v56 = vsel %vm331_vm5, %v332_v48, %v1719_v50  ;;  %v747_v14 = vsel %vm745_vm9, %v332_v48, %v1719_v50  ;;  %v961_v24 = vld [vmem:[%s2284_s3 + $0x8] sm:$0xff]  ;;  %v958_v31 = vld [vmem:[%s2283_s2 + $0x10] sm:$0xff]  ;;  %v959_v26 = vld [vmem:[%s2283_s2 + $0x18] sm:$0xff] }
 0x148   :  { %v439_v58 = vsel %vm428_vm7, nan, %v438_v55  ;;  %v2160_v60 = vsel %vm428_vm7, nan, %v851_v1  ;;  %v524_v15 = vxor.u32 2147483648, %v523_v3  ;;  %vm441_vm7 = vcmp.le.f32.partialorder %v440_v59, 0.7853982  ;;  %v1166_v27 = vld [vmem:[%s2285_s4] sm:$0xff] }
 0x149   :  { %v2162_v62 = vpack.c.bf16 %v439_v58, %v231_v57  ;;  %v1644_v17 = vpack.c.bf16 %v2160_v60, %v2156_v30  ;;  %v529_v36 = vsel %vm441_vm7, 0, %v527_v18  ;;  %v330_v37 = vsel %vm328_vm2, %v1717_v25, %v329_v34  ;;  %v1169_v55 = vld [vmem:[%s2285_s4 + $0x18] sm:$0xff] }
 0x14a   :  { %v525_v16 = vsel %vm442_vm6, %v524_v15, %v523_v3  ;;  %v533_v8 = vadd.s32 3, %v529_v36  ;;  %v946_v59 = vand.u32 3, %v529_v36  ;;  %v744_v32 = vsel %vm742_vm8, %v1717_v25, %v329_v34 }
 0x14b   :  { %v528_v23 = vsel %vm441_vm7, %v1892_v22, %v525_v16  ;;  %v334_v29 = vsel %vm327_vm10, %v330_v37, %v333_v56  ;;  %v748_v44 = vsel %vm741_vm11, %v744_v32, %v747_v14  ;;  %vm324_vm4 = vweird.f32 %v1882_v13  ;;  %v963_v13 = vld [vmem:[%s2284_s3 + $0x18] sm:$0xff] }
 0x14c   :  { %1720 = vcosq.f32 %v528_v23  ;;  %v534_v33 = vand.u32 3, %v533_v8  ;;  %vm951_vm13 = vcmp.eq.s32.totalorder %v946_v59, 2  ;;  %vm948_vm15 = vcmp.eq.s32.totalorder %v946_v59, 0 }
 0x14d   :  { %1722 = vsinq.f32 %v528_v23  ;;  %vm947_vm3 = vcmp.lt.s32.totalorder %v946_v59, 2  ;;  %vm532_vm6 = vweird.f32 %v1892_v22  ;;  %v335_v35 = vsel %vm324_vm4, nan, %v334_v29  ;;  %v960_v22 = vld [vmem:[%s2284_s3] sm:$0xff] }
 0x14e   :  { %vm539_vm12 = vcmp.eq.s32.totalorder %v534_v33, 2  ;;  %vm536_vm14 = vcmp.eq.s32.totalorder %v534_v33, 0  ;;  %vm535_vm1 = vcmp.lt.s32.totalorder %v534_v33, 2  ;;  %v749_v49 = vsel %vm324_vm4, nan, %v748_v44 }
 0x156   :  { %v1721_v21 = vpop.eup %1720 }
 0x157   :  { %v1723_v38 = vpop.eup %1722  ;;  %v540_v40 = vxor.u32 2147483648, %v1721_v21 }
 0x158   :  { %v537_v42 = vxor.u32 2147483648, %v1723_v38 }
 0x159   :  { %v541_v46 = vsel %vm539_vm12, %v540_v40, %v1723_v38  ;;  %v953_v51 = vsel %vm951_vm13, %v540_v40, %v1723_v38 }
 0x15a   :  { %v538_v43 = vsel %vm536_vm14, %v1721_v21, %v537_v42  ;;  %v950_v52 = vsel %vm948_vm15, %v1721_v21, %v537_v42 }
 0x15b   :  { %v542_v47 = vsel %vm535_vm1, %v538_v43, %v541_v46  ;;  %v954_v53 = vsel %vm947_vm3, %v950_v52, %v953_v51 }
 0x15c   :  { %v543_v54 = vsel %vm532_vm6, nan, %v542_v47  ;;  %v955_v61 = vsel %vm532_vm6, nan, %v954_v53  ;;  %v1319_v53 = vld [vmem:[%s2287_s6] sm:$0xff] }
 0x15d   :  { %v1634_v9 = vpack.c.bf16 %v543_v54, %v335_v35  ;;  %v1642_v11 = vpack.c.bf16 %v955_v61, %v749_v49  ;;  %v1320_v35 = vld [vmem:[%s2287_s6 + $0x8] sm:$0xff]  ;;  %v1321_v54 = vld [vmem:[%s2287_s6 + $0x10] sm:$0xff]  ;;  %v1322_v49 = vld [vmem:[%s2287_s6 + $0x18] sm:$0xff] }
 0x15f   :  { %1635 = vmatprep.subr.bf16.mxu0 %v1634_v9  ;;  %1662 = vmatprep.subr.bf16.mxu1 %v1634_v9 }
 0x160   :  { %1637 = vmatpush1.bf16.msra.mxu0 %v2162_v62  ;;  %1663 = vmatpush1.bf16.msra.mxu1 %v2162_v62 }
 0x161   :  { %1639 = vmatprep.subr.bf16.mxu1 %v1857_v4  ;;  %v957_v4 = vld [vmem:[%s2283_s2 + $0x8] sm:$0xff] }
 0x163   :  { %1616 = vmatmul.mubr.msk.f32.vlgmr.msra.gmra.mrb[0].mxu1 %vm44_vm0, %v963_v13  ;;  %1613 = vmatmul.mubr.msk.f32.vlgmr.msra.gmra.mrb[4].mxu0 %vm44_vm0, %v960_v22 }
 0x164   :  { %1641 = vmatpush1.bf16.msra.mxu1 %v1864_v7  ;;  %1141 = vmatprep.mubr.f32.mxu1 %v1780_v6  ;;  %v962_v7 = vld [vmem:[%s2284_s3 + $0x10] sm:$0xff] }
 0x165   :  { %1643 = vmatprep.subr.bf16.mxu1 %v1642_v11  ;;  %1046 = vmatprep.mubr.f32.mxu0 %v1780_v6 }
 0x167   :  { %1617 = vmatmul.mubr.msk.f32.vlgmr.msra.gmra.mrb[2].mxu1 %vm44_vm0, %v956_v12  ;;  %1614 = vmatmul.mubr.msk.f32.gmra.mrb[6].mxu0 %vm44_vm0, %v961_v24 }
 0x168   :  { %1645 = vmatpush1.bf16.msra.mxu1 %v1644_v17  ;;  %1147 = vmatprep.mubr.f32.mxu1 %v1780_v6 }
 0x169   :  { %1052 = vmatprep.mubr.f32.mxu0 %v1780_v6 }
 0x16b   :  { %1618 = vmatmul.mubr.msk.f32.gmra.mrb[4].mxu1 %vm44_vm0, %v957_v4  ;;  %1615 = vmatmul.mubr.msk.f32.gmra.mrb[8].mxu0 %vm44_vm0, %v962_v7 }
 0x16c   :  { %1153 = vmatprep.mubr.f32.mxu1 %v1780_v6  ;;  %1424 = vmatprep.mubr.f32.mxu0 %v1780_v6 }
 0x16f   :  { %1619 = vmatmul.mubr.msk.f32.gmra.mrb[6].mxu1 %vm44_vm0, %v958_v31 }
 0x170   :  { %1159 = vmatprep.mubr.f32.mxu1 %v1780_v6 }
 0x173   :  { %1620 = vmatmul.mubr.msk.f32.gmra.mrb[0].mxu1 %vm44_vm0, %v959_v26 }
 0x174   :  { %1246 = vmatprep.mubr.f32.mxu1 %v1780_v6 }
 0x177   :  { %1621 = vmatmul.mubr.msk.f32.vlgmr.msra.gmra.mrb[2].mxu1 %vm44_vm0, %v1166_v27 }
 0x178   :  { %1252 = vmatprep.mubr.f32.mxu1 %v1780_v6 }
 0x17b   :  { %1622 = vmatmul.mubr.msk.f32.gmra.mrb[4].mxu1 %vm44_vm0, %v1167_v45 }
 0x17c   :  { %1258 = vmatprep.mubr.f32.mxu1 %v1780_v6 }
 0x17f   :  { %1623 = vmatmul.mubr.msk.f32.gmra.mrb[6].mxu1 %vm44_vm0, %v1168_v41 }
 0x180   :  { %1264 = vmatprep.mubr.f32.mxu1 %v1780_v6 }
 0x183   :  { %1624 = vmatmul.mubr.msk.f32.gmra.mrb[0].mxu1 %vm44_vm0, %v1169_v55  ;;  %vm1347_vm0 = vcmask 261120  }
 0x1ac   :  { %v1286_v62 = vpop.permute.xlu0 %1285  ;;  %v1296_v19 = vpop.permute.xlu1 %1295 }
 0x1b0   :  { %v1291_v18 = vpop.permute.xlu0 %1290  ;;  %v1301_v48 = vpop.permute.xlu1 %1300 }
 0x1b4   :  { %v1330_v61 = vpop.permute.xlu0 %1329  ;;  %v1335_v12 = vpop.permute.xlu1 %1334 }
 0x1b8   :  { %v1340_v26 = vpop.permute.xlu0 %1339 }
 0x236   :  { %v1042_v1 = vpop.f32.mrb[4].mxu0 }
 0x237   :  { %v1044_v57 = vpop.f32.mrb[5].mxu0 }
 0x23a   :  { %v1048_v58 = vpop.f32.mrb[6].mxu0 }
 0x23b   :  { %v1050_v30 = vpop.f32.mrb[7].mxu0 }
 0x23e   :  { %v1054_v60 = vpop.f32.mrb[8].mxu0 }
 0x23f   :  { %v1056_v39 = vpop.f32.mrb[9].mxu0 }
 0x24a   :  { %v1248_v17 = vpop.f32.mrb[2].mxu1 }
 0x24b   :  { %v1664_v63 = vadd.f32 %v1248_v17, %v1042_v1  ;;  %v1250_v0 = vpop.f32.mrb[3].mxu1 }
 0x24c   :  { %v1665_v10 = vadd.f32 %v1250_v0, %v1044_v57 }
 0x24d   :  { %v1303_v3 = vadd.f32 %v1664_v63, %v1286_v62 }
 0x24e   :  { %v1304_v5 = vadd.f32 %v1665_v10, %v1286_v62  ;;  %v1254_v20 = vpop.f32.mrb[4].mxu1 }
 0x24f   :  { %v1666_v15 = vadd.f32 %v1254_v20, %v1048_v58  ;;  %v1256_v16 = vpop.f32.mrb[5].mxu1  ;;  %1724 = vtanh.f32 %v1303_v3 }
 0x250   :  { %v1667_v23 = vadd.f32 %v1256_v16, %v1050_v30  ;;  %1726 = vtanh.f32 %v1304_v5 }
 0x251   :  { %v1305_v25 = vadd.f32 %v1666_v15, %v1291_v18 }
 0x252   :  { %v1306_v50 = vadd.f32 %v1667_v23, %v1291_v18  ;;  %v1260_v36 = vpop.f32.mrb[6].mxu1  ;;  %v1457_v18 = vld [vmem:[%s2289_s8] sm:$0x1]  ;;  %s1756_s8 = scalar_lea.vmem %s1572_s23, 32 }
 0x253   :  { %1728 = vtanh.f32 %v1305_v25  ;;  %v1668_v28 = vadd.f32 %v1260_v36, %v1054_v60  ;;  %v1262_v2 = vpop.f32.mrb[7].mxu1  ;;  %v1788_v25 = vmov 1966171168   ;;  %p1757_p0 = scmp.ne.s32.totalorder %s1572_s23, %s1756_s8  ;;  %p1762_p2 = scmp.lt.s32.totalorder %s1756_s8, %s1756_s8 }
 0x254   :  { %1730 = vtanh.f32 %v1306_v50  ;;  %v1669_v8 = vadd.f32 %v1262_v2, %v1056_v39  ;;  %v1546_v50 = vunpack.c.l.s4 %v1788_v25 }
 0x255   :  { %v1307_v34 = vadd.f32 %v1668_v28, %v1296_v19  ;;  %v1462_v28 = vpop.permute.xlu0 %1461  ;;  %p1763_p3 = por %p1762_p2, %p1761_p1 }
 0x256   :  { %v1308_v59 = vadd.f32 %v1669_v8, %v1296_v19  ;;  %v1266_v37 = vpop.f32.mrb[0].mxu1  ;;  %v1464_v19 = vlaneseq  ;;  %v1547_v2 = vunpack.c.0.s8 %v1546_v50 }
 0x257   :  { %1732 = vtanh.f32 %v1307_v34  ;;  %v1309_v56 = vadd.f32 %v1301_v48, %v1266_v37  ;;  %v1268_v33 = vpop.f32.mrb[1].mxu1  ;;  %p1764_p4 = pnand %p1763_p3, %p1757_p0 }
 0x258   :  { %1734 = vtanh.f32 %v1308_v59  ;;  %v1310_v32 = vadd.f32 %v1301_v48, %v1268_v33  ;;  %v1465_v23 = vshrl.u32 %v1464_v19, 7  ;;  %vm1562_vm7 = vcmp.lt.s32.totalorder %v1464_v19, 256 }
 0x259   :  { %1736 = vtanh.f32 %v1309_v56  ;;  %v1725_v14 = vpop.eup %1724 }
 0x25a   :  { %1738 = vtanh.f32 %v1310_v32  ;;  %v1727_v21 = vpop.eup %1726  ;;  %v1466_v36 = vsub.s32 0, %v1465_v23  ;;  %v1550_v56 = vsub.s32 %v1547_v2, %v1465_v23 }
 0x25c   :  { %v1467_v8 = vrot.slane %v1462_v28, %v1466_v36 }
 0x25d   :  { %v1729_v38 = vpop.eup %1728 }
 0x25e   :  { %v1731_v29 = vpop.eup %1730  ;;  %v1648_v40 = vpack.c.bf16 %v1729_v38, %v1725_v14 }
 0x25f   :  { %v1646_v42 = vpack.c.bf16 %v1731_v29, %v1727_v21 }
 0x261   :  { %v1733_v44 = vpop.eup %1732  ;;  %1647 = vmatprep.subr.bf16.mxu0 %v1646_v42 }
 0x262   :  { %v1735_v46 = vpop.eup %1734  ;;  %1649 = vmatpush1.bf16.msra.mxu0 %v1648_v40 }
 0x263   :  { %v1737_v51 = vpop.eup %1736 }
 0x264   :  { %v1739_v43 = vpop.eup %1738  ;;  %v1652_v52 = vpack.c.bf16 %v1737_v51, %v1733_v44 }
 0x265   :  { %v1650_v47 = vpack.c.bf16 %v1739_v43, %v1735_v46 }
 0x267   :  { %1651 = vmatprep.subr.bf16.mxu0 %v1650_v47 }
 0x268   :  { %1653 = vmatpush1.bf16.msra.mxu0 %v1652_v52 }
 0x26b   :  { %1625 = vmatmul.mubr.msk.f32.vlgmr.msra.gmra.mrb[10].mxu0 %vm1347_vm0, %v1319_v53 }
 0x26c   :  { %1430 = vmatprep.mubr.f32.mxu0 %v1780_v6 }
 0x26f   :  { %1626 = vmatmul.mubr.msk.f32.gmra.mrb[12].mxu0 %vm1347_vm0, %v1320_v35 }
 0x270   :  { %1436 = vmatprep.mubr.f32.mxu0 %v1780_v6 }
 0x273   :  { %1627 = vmatmul.mubr.msk.f32.gmra.mrb[14].mxu0 %vm1347_vm0, %v1321_v54 }
 0x274   :  { %1442 = vmatprep.mubr.f32.mxu0 %v1780_v6 }
 0x277   :  { %1628 = vmatmul.mubr.msk.f32.gmra.mrb[16].mxu0 %vm1347_vm0, %v1322_v49 }
 0x278   :  { %1535 = vmatprep.mubr.f32.mxu0 %v1780_v6  ;;  %v1345_v6 = vpop.permute.xlu1 %1344 }
 0x33e   :  { %v1426_v9 = vpop.f32.mrb[10].mxu0 }
 0x33f   :  { %v1427_v11 = vadd.f32 %v1426_v9, %v1330_v61  ;;  %v1428_v13 = vpop.f32.mrb[11].mxu0 }
 0x340   :  { %v1429_v22 = vadd.f32 %v1428_v13, %v1330_v61 }
 0x341   :  { %1740 = vtanh.f32 %v1427_v11 }
 0x342   :  { %v1432_v24 = vpop.f32.mrb[12].mxu0  ;;  %1742 = vtanh.f32 %v1429_v22 }
 0x343   :  { %v1433_v4 = vadd.f32 %v1432_v24, %v1335_v12  ;;  %v1434_v7 = vpop.f32.mrb[13].mxu0 }
 0x344   :  { %v1435_v31 = vadd.f32 %v1434_v7, %v1335_v12 }
 0x345   :  { %1744 = vtanh.f32 %v1433_v4 }
 0x346   :  { %1746 = vtanh.f32 %v1435_v31  ;;  %v1438_v27 = vpop.f32.mrb[14].mxu0 }
 0x347   :  { %v1439_v45 = vadd.f32 %v1438_v27, %v1340_v26  ;;  %v1440_v41 = vpop.f32.mrb[15].mxu0 }
 0x348   :  { %v1441_v55 = vadd.f32 %v1440_v41, %v1340_v26 }
 0x349   :  { %1748 = vtanh.f32 %v1439_v45 }
 0x34a   :  { %v1444_v1 = vpop.f32.mrb[16].mxu0  ;;  %1750 = vtanh.f32 %v1441_v55 }
 0x34b   :  { %v1445_v57 = vadd.f32 %v1444_v1, %v1345_v6  ;;  %v1446_v58 = vpop.f32.mrb[17].mxu0  ;;  %v1741_v60 = vpop.eup %1740 }
 0x34c   :  { %v1447_v30 = vadd.f32 %v1446_v58, %v1345_v6  ;;  %v1743_v39 = vpop.eup %1742 }
 0x34d   :  { %1752 = vtanh.f32 %v1445_v57 }
 0x34e   :  { %1754 = vtanh.f32 %v1447_v30 }
 0x34f   :  { %v1745_v62 = vpop.eup %1744 }
 0x350   :  { %v1747_v17 = vpop.eup %1746  ;;  %v1656_v63 = vpack.c.bf16 %v1745_v62, %v1741_v60 }
 0x351   :  { %v1654_v0 = vpack.c.bf16 %v1747_v17, %v1743_v39 }
 0x353   :  { %1655 = vmatprep.subr.bf16.mxu0 %v1654_v0  ;;  %v1749_v10 = vpop.eup %1748 }
 0x354   :  { %1657 = vmatpush1.bf16.msra.mxu0 %v1656_v63  ;;  %v1751_v3 = vpop.eup %1750 }
 0x357   :  { %v1753_v5 = vpop.eup %1752 }
 0x358   :  { %v1755_v20 = vpop.eup %1754  ;;  %v1660_v15 = vpack.c.bf16 %v1753_v5, %v1749_v10 }
 0x359   :  { %v1658_v16 = vpack.c.bf16 %v1755_v20, %v1751_v3 }
 0x35b   :  { %1659 = vmatprep.subr.bf16.mxu0 %v1658_v16 }
 0x35c   :  { %1661 = vmatpush1.bf16.msra.mxu0 %v1660_v15 }
 0x35f   :  { %1629 = vmatmul.mubr.msk.f32.vlgmr.msra.gmra.mrb[18].mxu0 %vm1347_vm0, %v1457_v18 }
 0x432   :  { %v1537_v34 = vpop.f32.mrb[18].mxu0 }
 0x433   :  { %v1538_v48 = vadd.f32 %v1537_v34, %v1467_v8  ;;  %v1539_v59 = vpop.f32.mrb[19].mxu0 }
 0x434   :  { %v1540_v37 = vadd.f32 %v1539_v59, %v1467_v8 }
 0x436   :  { %v1544_v33 = vcombine.low %v1538_v48, %v1540_v37 }
 0x438   :  { %v1551_v32 = vrot.slane %v1544_v33, %v1550_v56 }
 0x43a   :  { %v1558_v14 = vrot.slane %v1551_v32, %v1550_v56 }
 0x43c   :  { %1564 = vst.msk [vmem:[#allocation3] sm:$0x3] %vm1562_vm7, %v1558_v14 }
 0x43d   :  { %1767 = shalt.err (!%p1764_p4)
}
 0x43e   :  { %s1768_s1 = scalar_lea.hbm %s2291_s10, 32 }
 0x43f   :  { %p1769_p5 = scmp.ne.s32.totalorder %s2291_s10, %s1768_s1  ;;  %p1772_p6 = scmp.lt.u32.totalorder %s1768_s1, %s2291_s10 }
 0x441   :  { %p1774_p7 = pnand %p1772_p6, %p1769_p5 }
 0x443   :  { %1777 = shalt.err (!%p1774_p7)
}
 0x444   :  { %1574 = dma.vmem_to_hbm [thread:$0]  %s1572_s23, 32, %s2291_s10, [#allocation4]  }
 0x445   :  { %1778 = dma.done.wait [#allocation4], 32  }
 0x446   :  { %1779 = vsyncadd [#allocation4], 4294967264 }
 0x447   :  { %1578 = vsyncpa [#allocation4], 1 }

</bundles_post_ra>
